<compile_context>
chip_gen: v7x
topology: tpu7x:2x2x1
jax: 0.10.0
libtpu: 0.0.40
codegen_flags: <defaults>
</compile_context>

<pallas_src>
import itertools
import math

import numpy as np
import jax
import jax.numpy as jnp
from jax import lax
from jax.experimental import pallas as pl
from jax.experimental.pallas import tpu as pltpu


# (dh, dw) such that out[i, j] = max_{k>=0} x[i - k*dh, j - k*dw]
_DIRS = (
    (-1, 0),   # top_pool
    (+1, 0),   # bottom_pool
    (0, -1),   # left_pool
    (0, +1),   # right_pool
    (+1, +1),  # pos_diagonal
    (+1, -1),  # pos_anti_diagonal
    (-1, -1),  # neg_diagonal
    (-1, +1),  # neg_anti_diagonal
)

# ~512 KiB of fp32 per block.  The in-kernel working set (x, per-direction
# running max, rolled temp, fp32 acc, ~32 cached mask planes) is ~10-16x this,
# which plus double-buffered I/O stays far below the 32 MiB scoped-VMEM budget
# on v5e / v6e / v7x.
_BLOCK_ELEMS_MAX = 128 * 1024
_VMEM_LIMIT_BYTES = 32 * 1024 * 1024


def _cdiv(a, b):
    return -(-a // b)


def _pow2_steps(limit):
    """Prefix-doubling shifts 1,2,4,... covering a chain of length `limit`."""
    steps, s = [], 1
    while s < limit:
        steps.append(s)
        s *= 2
    return steps


# ---------------------------------------------------------------------------
# pltpu.roll rotation-direction probe (tiny one-off kernel, cached per backend)
# so the validity masks always match the rolled data regardless of the rotate
# sign convention.
# ---------------------------------------------------------------------------
_ROLL_CONV_CACHE = {}


def _roll_conventions():
    key = jax.default_backend()
    if key not in _ROLL_CONV_CACHE:
        def probe(x_ref, o_ref):
            o_ref[...] = pltpu.roll(
                pltpu.roll(x_ref[...], shift=1, axis=0), shift=1, axis=1)

        xp = jnp.arange(8 * 128, dtype=jnp.float32).reshape(8, 128)
        out = pl.pallas_call(
            probe, out_shape=jax.ShapeDtypeStruct((8, 128), jnp.float32))(xp)
        v = int(jax.device_get(out)[0, 0])
        # jnp.roll convention: out[0, 0] pulls from (7, 127) -> 7*128 + 127.
        _ROLL_CONV_CACHE[key] = (v // 128 == 7, v % 128 == 127)
    return _ROLL_CONV_CACHE[key]


def _roll_amount(signed_shift, n, like_jnp):
    """Non-negative roll amount implementing out[i] = in[i - signed_shift]."""
    a = signed_shift if like_jnp else -signed_shift
    return a % n


# ---------------------------------------------------------------------------
# Layout planning
# ---------------------------------------------------------------------------
def _plan_layout(nc, h, w):
    """Pick (c_pack, w_pad, g, g_blk, g_pad) for the packed 2-D layout.

    (nc, h, w) -> zero-pad -> (g_pad, c_pack, h, w_pad) -> (g_pad*h, c_pack*w_pad)
      * lanes = c_pack*w_pad is always a multiple of 128 (lane-dense stores).
      * the grid (g_pad // g_blk steps) keeps >= 2 steps whenever nc >= 2 so
        both v7x TensorCores get real work (costs nothing on 1-TC v5e/v6e).
      * g_blk groups are packed along sublanes so blocks grow toward
        _BLOCK_ELEMS_MAX and amortize per-grid-step overhead.
    """
    # channels per lane group + padded W: minimize padding waste, keep >= 2 groups
    best = None
    c_cap = 1 if nc < 2 else max(1, nc // 2)
    c = 1
    while c <= min(c_cap, 128):
        m = 128 // math.gcd(c, 128)            # w_pad must be a multiple of m
        w_pad = _cdiv(w, m) * m
        lanes = c * w_pad
        g = _cdiv(nc, c)
        waste = (g * c * w_pad) / float(nc * w)
        key = (waste, lanes > 512, -lanes)     # min waste, prefer lanes <= 512, then bigger
        if best is None or key < best[0]:
            best = (key, c, w_pad, g)
        c *= 2
    _, c_pack, w_pad, g = best
    lanes = c_pack * w_pad

    # channel-groups per block (packed along sublanes)
    align = 8 // math.gcd(h, 8)                # keep block rows a multiple of 8
    g_blk = max(1, _BLOCK_ELEMS_MAX // (h * lanes))
    if g >= 2 * align:
        g_blk = min(g_blk, g // 2)             # keep >= 2 grid steps
    g_blk = max(align, (g_blk // align) * align)
    g_blk = min(g_blk, _cdiv(g, align) * align)
    g_pad = _cdiv(g, g_blk) * g_blk
    return c_pack, w_pad, g, g_blk, g_pad


# ---------------------------------------------------------------------------
# Kernel
# ---------------------------------------------------------------------------
def _make_pool255_kernel(h, w, w_pad, rows_blk, lanes,
                         sub_like_jnp, lane_like_jnp, acc_dtype=jnp.float32):
    h_steps = _pow2_steps(h)
    w_steps = _pow2_steps(w)
    d_steps = _pow2_steps(min(h, w))
    step_map = {}
    for dh, dw in _DIRS:
        step_map[(dh, dw)] = (h_steps if dw == 0 else
                              (w_steps if dh == 0 else d_steps))

    def _mod_plane(idx, m):
        if m & (m - 1) == 0:                   # power of two: cheap bitwise and
            return jnp.bitwise_and(idx, m - 1)
        return idx % m                         # rare non-pow2 fallback

    def kernel(x_ref, o_ref):
        # TODO(synk): for bf16 inputs on v5e an up-cast to f32 here would avoid
        #             repeated pack/unpack (no native bf16 VPU on v5e); kept in
        #             the input dtype since the test path is f32.
        x = x_ref[...]                         # (rows_blk, lanes), input dtype
        neg_inf = jnp.array(-jnp.inf, dtype=x.dtype)

        # hoisted index planes (built once per block, no extra DMA stream)
        row = _mod_plane(lax.broadcasted_iota(jnp.int32, (rows_blk, lanes), 0), h)
        col = _mod_plane(lax.broadcasted_iota(jnp.int32, (rows_blk, lanes), 1), w_pad)

        axis_masks = {}                        # (axis, dir, s) -> bool plane

        def axis_mask(axis, d, s):
            key = (axis, d, s)
            m = axis_masks.get(key)
            if m is None:
                if axis == 0:                  # H / sublane axis (per group)
                    m = (row >= s) if d > 0 else (row < h - s)
                else:                          # local-W / lane axis (per channel)
                    m = (col >= s) if d > 0 else (col < w - s)
                axis_masks[key] = m
            return m

        combo_masks = {}                       # (dh, dw, s) -> combined plane

        def mask_for(dh, dw, s):
            key = (dh, dw, s)
            m = combo_masks.get(key)
            if m is None:
                if dh != 0 and dw != 0:
                    m = jnp.logical_and(axis_mask(0, dh, s), axis_mask(1, dw, s))
                elif dh != 0:
                    m = axis_mask(0, dh, s)
                else:
                    m = axis_mask(1, dw, s)
                combo_masks[key] = m
            return m

        def shifted(v, s, dh, dw):
            # r[i, j] = v[i - s*dh, j - s*dw]; positions whose source falls
            # outside the (h, w) window of their own packed channel / group
            # (incl. roll wrap-around and W/channel padding) become -inf.
            r = v
            if dh != 0:
                r = pltpu.roll(
                    r, shift=_roll_amount(s * dh, rows_blk, sub_like_jnp), axis=0)
            if dw != 0:
                r = pltpu.roll(
                    r, shift=_roll_amount(s * dw, lanes, lane_like_jnp), axis=1)
            return jnp.where(mask_for(dh, dw, s), r, neg_inf)

        def dir_cummax(dh, dw):
            out = x
            for s in step_map[(dh, dw)]:       # static, unrolled at trace time
                out = jnp.maximum(out, shifted(out, s, dh, dw))
            return out

        # mean over all 255 subset-means == (1/8) * sum of the 8 pools (exact)
        pools = [dir_cummax(dh, dw).astype(acc_dtype) for dh, dw in _DIRS]
        while len(pools) > 1:                  # pairwise tree sum
            pools = [pools[i] + pools[i + 1] for i in range(0, len(pools), 2)]
        o_ref[...] = (pools[0] * (1.0 / 8.0)).astype(o_ref.dtype)

    return kernel


# ---------------------------------------------------------------------------
# Host wrapper
# ---------------------------------------------------------------------------
def pool255(x):
    """Pool255 forward: (1/8) * sum of the 8 directional cumulative-max pools."""
    if not jnp.issubdtype(x.dtype, jnp.floating):
        raise TypeError("pool255 requires a floating dtype (uses -inf padding).")
    n, c, h, w = x.shape
    nc = n * c
    itemsize = jnp.dtype(x.dtype).itemsize

    c_pack, w_pad, g, g_blk, g_pad = _plan_layout(nc, h, w)
    lanes = c_pack * w_pad
    rows_blk = g_blk * h
    grid = g_pad // g_blk
    nc_pad = g_pad * c_pack

    # (n, c, h, w) -> (g_pad*h, lanes): channel slices contiguous along lanes,
    # channel-groups stacked along sublanes.  Zero padding (extra channels /
    # extra W columns) is never read by real output positions (validity masks)
    # and is sliced away below.
    xr = x.reshape(nc, h, w)
    if nc_pad != nc or w_pad != w:
        xr = jnp.pad(xr, ((0, nc_pad - nc), (0, 0), (0, w_pad - w)))
    xr = (xr.reshape(g_pad, c_pack, h, w_pad)
            .transpose(0, 2, 1, 3)
            .reshape(g_pad * h, lanes))

    sub_like_jnp, lane_like_jnp = _roll_conventions()
    kernel = _make_pool255_kernel(h, w, w_pad, rows_blk, lanes,
                                  sub_like_jnp, lane_like_jnp)

    # advisory cost estimate (~3-4 vector ops per doubling step per element)
    steps_axis = 2 * len(_pow2_steps(h)) + 2 * len(_pow2_steps(w))
    steps_diag = 4 * len(_pow2_steps(min(h, w)))
    elems = g_pad * h * lanes
    cost = pl.CostEstimate(
        flops=int((3 * steps_axis + 4 * steps_diag + 9) * elems),
        transcendentals=0,
        bytes_accessed=int(2 * elems * itemsize),
    )

    out = pl.pallas_call(
        kernel,
        out_shape=jax.ShapeDtypeStruct((g_pad * h, lanes), x.dtype),
        grid_spec=pltpu.PrefetchScalarGridSpec(
            num_scalar_prefetch=0,
            grid=(grid,),
            in_specs=[pl.BlockSpec((rows_blk, lanes), lambda i: (i, 0))],
            out_specs=pl.BlockSpec((rows_blk, lanes), lambda i: (i, 0)),
        ),
        compiler_params=pltpu.CompilerParams(
            dimension_semantics=("parallel",),
            vmem_limit_bytes=_VMEM_LIMIT_BYTES,
        ),
        cost_estimate=cost,
    )(xr)

    out = (out.reshape(g_pad, h, c_pack, w_pad)
              .transpose(0, 2, 1, 3)
              .reshape(nc_pad, h, w_pad)[:nc, :, :w]
              .reshape(n, c, h, w))
    return out


# ----------------- pure-numpy reference (full 255-subset forward) -----------
def _ref_dir_pool(x, dh, dw):
    N, C, H, W = x.shape
    out = np.empty_like(x)
    for i in range(H):
        for j in range(W):
            best = x[:, :, i, j].copy()
            k = 1
            while True:
                ii, jj = i - k * dh, j - k * dw
                if not (0 <= ii < H and 0 <= jj < W):
                    break
                best = np.maximum(best, x[:, :, ii, jj])
                k += 1
            out[:, :, i, j] = best
    return out


def ref_forward(x_np):
    pools = [_ref_dir_pool(x_np, dh, dw) for dh, dw in _DIRS]
    subsets = []
    for L in range(0, 9):
        for s in itertools.combinations(range(8), L):
            subsets.append(s)
    subsets = subsets[1:]  # drop the empty subset, exactly like the PyTorch module
    f = [np.mean(np.stack([pools[i] for i in s]), axis=0) for s in subsets]
    return np.mean(np.stack(f), axis=0)


if __name__ == "__main__":
    key = jax.random.PRNGKey(0)
    N, C, H, W = 2, 4, 16, 16
    x = jax.random.normal(key, (N, C, H, W), dtype=jnp.float32)

    y = pool255(x)
    y = jax.block_until_ready(y)

    y_ref = ref_forward(np.asarray(x))
    np.testing.assert_allclose(np.asarray(y), y_ref, rtol=1e-5, atol=1e-5)

    print("KERNEL_OK")
</pallas_src>

<mosaic_0001>
module attributes {stable_mosaic.version = 11 : i64} {
  func.func @probe(%arg0: memref<8x128xf32, #tpu.memory_space<vmem>>, %arg1: memref<8x128xf32, #tpu.memory_space<vmem>>) attributes {dimension_semantics = [], scalar_prefetch = 0 : i64, scratch_operands = 0 : i64, tpu.core_type = #tpu.core_type<tc>} {
    %c0 = arith.constant 0 : index
    %c0_0 = arith.constant 0 : index
    %0 = vector.load %arg0[%c0, %c0_0] : memref<8x128xf32, #tpu.memory_space<vmem>>, vector<8x128xf32>
    %c1_i32 = arith.constant 1 : i32
    %1 = tpu.dynamic_rotate %0 by %c1_i32 dim 0 : vector<8x128xf32>, i32 -> vector<8x128xf32>
    %c1_i32_1 = arith.constant 1 : i32
    %2 = tpu.dynamic_rotate %1 by %c1_i32_1 dim 1 : vector<8x128xf32>, i32 -> vector<8x128xf32>
    %c0_2 = arith.constant 0 : index
    %c0_3 = arith.constant 0 : index
    %3 = vector.load %arg1[%c0_2, %c0_3] : memref<8x128xf32, #tpu.memory_space<vmem>>, vector<8x128xf32>
    tpu.vector_store %arg1[%c0_2, %c0_3], %2 {strides = array<i32>} : memref<8x128xf32, #tpu.memory_space<vmem>>, vector<8x128xf32>,
    return
  }
}

</mosaic_0001>

<bundles_post_ra>
// kernel: tpu_custom_call.1
= control target key start
LH: loop header
LB: loop body
LE: loop exit
PB: predicated region body
PF: predicated region fallthrough
CT: control target
= control target key end

     0   :  { %6 = vsyncpa [#allocation3], 0  ;;  %s129_s0 = inlined_call_operand.hbm [shape: f32[8,128], index: 0, kind: input, shape index: {}]   ;;  %s130_s1 = inlined_call_operand.hbm [shape: f32[8,128], index: 1, kind: output, shape index: {}]  }
   0x1   :  { %7 = vsyncpa [#allocation4], 0  ;;  %s92_s6 = smov [#allocation2]   ;;  %s44_s10 = scalar_lea.hbm %s129_s0, 128 }
   0x2   :  { %s14_s7 = sshll.u32 %s92_s6, 4  ;;  %p45_p0 = scmp.ne.s32.totalorder %s129_s0, %s44_s10  ;;  %s15_s7 = int_to_ptr.vmem [resolvable:$true] %s14_s7 }
   0x3   :  { %p48_p1 = scmp.lt.u32.totalorder %s44_s10, %s129_s0 }
   0x5   :  { %p50_p2 = pnand %p48_p1, %p45_p0 }
   0x7   :  { %53 = shalt.err (!%p50_p2)
}
   0x8   :  { %s54_s15 = scalar_lea.vmem %s15_s7, 128  ;;  %p59_p4 = scmp.lt.s32.totalorder %s15_s7, %s15_s7 }
   0x9   :  { %p55_p3 = scmp.ne.s32.totalorder %s15_s7, %s54_s15  ;;  %p60_p5 = scmp.lt.s32.totalorder %s54_s15, %s54_s15 }
   0xb   :  { %p61_p6 = por %p60_p5, %p59_p4 }
   0xd   :  { %p62_p7 = pnand %p61_p6, %p55_p3 }
   0xf   :  { %65 = shalt.err (!%p62_p7)
}
  0x10   :  { %17 = dma.hbm_to_vmem [thread:$0]  %s129_s0, 128, %s15_s7, [#allocation3]  }
  0x11   :  { %88 = dma.done.wait [#allocation3], 128  }
  0x12   :  { %89 = vsyncadd [#allocation3], 4294967168  ;;  %v21_v0 = vld [vmem:[#allocation2] sm:$0xff]  ;;  %s93_s18 = smov 1   ;;  %s94_s19 = smov [#allocation5]  }
  0x13   :  { %v22_v1 = vrot.slane %v21_v0, 7  ;;  %s32_s20 = sshll.u32 %s94_s19, 4  ;;  %s33_s20 = int_to_ptr.vmem [resolvable:$true] %s32_s20 }
  0x14   :  { %s66_s21 = scalar_lea.vmem %s33_s20, 128  ;;  %p71_p9 = scmp.lt.s32.totalorder %s33_s20, %s33_s20 }
  0x15   :  { %23 = vrot.lane.b32.xlu0 %v22_v1, %s93_s18  ;;  %p67_p8 = scmp.ne.s32.totalorder %s33_s20, %s66_s21  ;;  %p72_p10 = scmp.lt.s32.totalorder %s66_s21, %s66_s21 }
  0x17   :  { %p73_p11 = por %p72_p10, %p71_p9 }
  0x19   :  { %p74_p12 = pnand %p73_p11, %p67_p8 }
  0x87   :  { %v24_v2 = vpop.permute.xlu0 %23 }
  0x88   :  { %25 = vst [vmem:[#allocation5] sm:$0xff] %v24_v2 }
  0x89   :  { %77 = shalt.err (!%p74_p12)
}
  0x8a   :  { %s78_s23 = scalar_lea.hbm %s130_s1, 128 }
  0x8b   :  { %p79_p13 = scmp.ne.s32.totalorder %s130_s1, %s78_s23  ;;  %p82_p0 = scmp.lt.u32.totalorder %s78_s23, %s130_s1 }
  0x8d   :  { %p84_p1 = pnand %p82_p0, %p79_p13 }
  0x8f   :  { %87 = shalt.err (!%p84_p1)
}
  0x90   :  { %35 = dma.vmem_to_hbm [thread:$0]  %s33_s20, 128, %s130_s1, [#allocation4]  }
  0x91   :  { %90 = dma.done.wait [#allocation4], 128  }
  0x92   :  { %91 = vsyncadd [#allocation4], 4294967168 }
  0x93   :  { %39 = vsyncpa [#allocation3], 1 }
  0x94   :  { %40 = vsyncpa [#allocation4], 1 }

</bundles_post_ra>
